<compile_context>
chip_gen: v7x
topology: tpu7x:2x2x1
jax: 0.10.0
libtpu: 0.0.40
codegen_flags: <defaults>
</compile_context>

<pallas_src>
import functools

import jax
import jax.numpy as jnp
from jax.experimental import pallas as pl
from jax.experimental.pallas import tpu as pltpu


def _round_up(v, m):
    return (v + m - 1) // m * m


def _pick_tm(R, cap):
    """Row-tile size: large for HBM efficiency, but >=2 row blocks when
    possible so the 'parallel' axis feeds both v7x TensorCores."""
    tm = min(cap, _round_up(R, 8))
    if R > 8 and pl.cdiv(R, tm) < 2:
        tm = max(8, _round_up(pl.cdiv(R, 2), 8))
    return tm


def _vmem_limit(estimate_bytes):
    """Explicit scoped-VMEM request: headroom over the estimate, floor at the
    32 MiB default, capped below v7x's 64 MiB physical VMEM."""
    return int(min(max(int(estimate_bytes * 1.5), 32 << 20), 60 << 20))


def _layernorm_rows(x_f32, gamma_f32, beta_f32, eps):
    """LayerNorm over the last axis. f32 math, centered variance (>= 0)."""
    inv_d = 1.0 / x_f32.shape[-1]
    mean = jnp.sum(x_f32, axis=-1, keepdims=True) * inv_d
    centered = x_f32 - mean
    var = jnp.sum(centered * centered, axis=-1, keepdims=True) * inv_d
    inv = jax.lax.rsqrt(var + eps)
    return centered * inv * gamma_f32 + beta_f32


# ----------------------- fused PreNorm + Linear kernels ----------------------
def _prenorm_linear_resident_kernel(x_ref, g_ref, b_ref, w_ref, bias_ref,
                                    o_ref, *, eps):
    # x_ref: (TM, D); g/b: (1, D); w_ref: (D, Dout_p) resident (DMA'd once);
    # bias_ref: (1, Dout_p); o_ref: (TM, Dout_p).
    x = x_ref[...].astype(jnp.float32)
    y = _layernorm_rows(x, g_ref[...].astype(jnp.float32),
                        b_ref[...].astype(jnp.float32), eps)
    acc = jnp.dot(y.astype(w_ref.dtype), w_ref[...],
                  preferred_element_type=jnp.float32)
    o_ref[...] = (acc + bias_ref[...].astype(jnp.float32)).astype(o_ref.dtype)


def _prenorm_linear_tiled_kernel(x_ref, g_ref, b_ref, w_ref, bias_ref, o_ref,
                                 xn_ref, *, eps):
    # 2-D grid (row tiles, Dout tiles). LayerNorm is computed once per row
    # tile (first Dout tile, j == 0), cached in a bf16 VMEM scratch and reused
    # across the sequential ("arbitrary", innermost) Dout axis.
    j = pl.program_id(1)

    @pl.when(j == 0)
    def _():
        x = x_ref[...].astype(jnp.float32)
        y = _layernorm_rows(x, g_ref[...].astype(jnp.float32),
                            b_ref[...].astype(jnp.float32), eps)
        xn_ref[...] = y.astype(xn_ref.dtype)

    acc = jnp.dot(xn_ref[...], w_ref[...], preferred_element_type=jnp.float32)
    o_ref[...] = (acc + bias_ref[...].astype(jnp.float32)).astype(o_ref.dtype)


def prenorm_linear(x, gamma, beta, w, bias, *, eps=1e-5,
                   mxu_dtype=jnp.bfloat16, resident_w_max_bytes=8 << 20):
    """Fused LayerNorm(last dim) + Linear: LayerNorm(x) @ w + bias.

    x: (B, N, D); w: (D, Dout); bias: (Dout,). Returns (B, N, Dout) in x.dtype.
    """
    B, N, D = x.shape
    Dout = w.shape[1]
    R = B * N

    # Weight already stored in bf16 by the Linear holder; only cast if needed.
    w_mxu = w if w.dtype == mxu_dtype else w.astype(mxu_dtype)

    # Lane-dense output: pad Dout up to a multiple of 128, slice off after.
    Dout_p = _round_up(Dout, 128)
    if Dout_p != Dout:
        w_mxu = jnp.pad(w_mxu, ((0, 0), (0, Dout_p - Dout)))
        bias = jnp.pad(bias, ((0, Dout_p - Dout),))

    x2 = x.reshape(R, D)
    g2 = gamma.reshape(1, D)
    b2 = beta.reshape(1, D)
    bias2 = bias.reshape(1, Dout_p).astype(jnp.float32)

    TM = _pick_tm(R, 256)
    n_rows = pl.cdiv(R, TM)
    x_bytes = x2.dtype.itemsize
    o_bytes = x2.dtype.itemsize
    w_bytes = D * Dout_p * jnp.dtype(mxu_dtype).itemsize

    if w_bytes <= resident_w_max_bytes:
        # Resident-weight path: w DMA'd once (constant index_map), 1-D grid.
        est = (2 * TM * D * x_bytes          # x double-buffer
               + 2 * w_bytes                 # w (conservative x2)
               + 2 * TM * Dout_p * o_bytes   # out double-buffer
               + 4 * 8 * D * 4 + 2 * 8 * Dout_p * 4)
        out = pl.pallas_call(
            functools.partial(_prenorm_linear_resident_kernel, eps=eps),
            out_shape=jax.ShapeDtypeStruct((R, Dout_p), x.dtype),
            grid_spec=pltpu.PrefetchScalarGridSpec(
                num_scalar_prefetch=0,
                grid=(n_rows,),
                in_specs=[
                    pl.BlockSpec((TM, D), lambda i: (i, 0)),
                    pl.BlockSpec((1, D), lambda i: (0, 0)),
                    pl.BlockSpec((1, D), lambda i: (0, 0)),
                    pl.BlockSpec((D, Dout_p), lambda i: (0, 0)),  # resident
                    pl.BlockSpec((1, Dout_p), lambda i: (0, 0)),
                ],
                out_specs=pl.BlockSpec((TM, Dout_p), lambda i: (i, 0)),
            ),
            compiler_params=pltpu.CompilerParams(
                dimension_semantics=("parallel",),
                vmem_limit_bytes=_vmem_limit(est),
            ),
        )(x2, g2, b2, w_mxu, bias2)
    else:
        # Large-weight path: tile Dout, cache normalized rows in VMEM scratch.
        TN = 256 if Dout_p % 256 == 0 else 128
        est = (2 * TM * D * x_bytes + TM * D * 2   # x dbl-buf + xn scratch
               + 2 * D * TN * 2                    # w tile double-buffer
               + 2 * TM * TN * o_bytes             # out double-buffer
               + 4 * 8 * D * 4 + 2 * 8 * TN * 4)
        out = pl.pallas_call(
            functools.partial(_prenorm_linear_tiled_kernel, eps=eps),
            out_shape=jax.ShapeDtypeStruct((R, Dout_p), x.dtype),
            grid_spec=pltpu.PrefetchScalarGridSpec(
                num_scalar_prefetch=0,
                grid=(n_rows, Dout_p // TN),
                in_specs=[
                    pl.BlockSpec((TM, D), lambda i, j: (i, 0)),
                    pl.BlockSpec((1, D), lambda i, j: (0, 0)),
                    pl.BlockSpec((1, D), lambda i, j: (0, 0)),
                    pl.BlockSpec((D, TN), lambda i, j: (0, j)),
                    pl.BlockSpec((1, TN), lambda i, j: (0, j)),
                ],
                out_specs=pl.BlockSpec((TM, TN), lambda i, j: (i, j)),
                scratch_shapes=[pltpu.VMEM((TM, D), mxu_dtype)],
            ),
            compiler_params=pltpu.CompilerParams(
                dimension_semantics=("parallel", "arbitrary"),
                vmem_limit_bytes=_vmem_limit(est),
            ),
        )(x2, g2, b2, w_mxu, bias2)

    if Dout_p != Dout:
        out = out[:, :Dout]
    return out.reshape(B, N, Dout)


# ------------------- standalone LayerNorm (generic-fn path) ------------------
def _layernorm_kernel(x_ref, g_ref, b_ref, o_ref, *, eps):
    x = x_ref[...].astype(jnp.float32)
    y = _layernorm_rows(x, g_ref[...].astype(jnp.float32),
                        b_ref[...].astype(jnp.float32), eps)
    o_ref[...] = y.astype(o_ref.dtype)


def layer_norm(x, gamma, beta, *, eps=1e-5):
    """LayerNorm over the last dim of (B, N, D), row-tiled Pallas kernel."""
    B, N, D = x.shape
    R = B * N
    TM = _pick_tm(R, 512)     # purely HBM-bound: big row tile
    x2 = x.reshape(R, D)
    g2 = gamma.reshape(1, D)
    b2 = beta.reshape(1, D)
    est = 4 * TM * D * x2.dtype.itemsize + 4 * 8 * D * 4

    out = pl.pallas_call(
        functools.partial(_layernorm_kernel, eps=eps),
        out_shape=jax.ShapeDtypeStruct((R, D), x.dtype),
        grid_spec=pltpu.PrefetchScalarGridSpec(
            num_scalar_prefetch=0,
            grid=(pl.cdiv(R, TM),),
            in_specs=[
                pl.BlockSpec((TM, D), lambda i: (i, 0)),
                pl.BlockSpec((1, D), lambda i: (0, 0)),
                pl.BlockSpec((1, D), lambda i: (0, 0)),
            ],
            out_specs=pl.BlockSpec((TM, D), lambda i: (i, 0)),
        ),
        compiler_params=pltpu.CompilerParams(
            dimension_semantics=("parallel",),
            vmem_limit_bytes=_vmem_limit(est),
        ),
    )(x2, g2, b2)
    return out.reshape(B, N, D)


# --------------------------------- PreNorm -----------------------------------
class Linear:
    """Dense layer used as `fn` inside PreNorm. Weight stored in bf16 ONCE
    (hoisted cast: no per-call f32->bf16 HBM round-trip)."""

    def __init__(self, w, b, mxu_dtype=jnp.bfloat16):
        self.w = w.astype(mxu_dtype)
        self.b = b.astype(jnp.float32)


class PreNorm:
    """JAX/Pallas equivalent of PyTorch PreNorm: forward(x) = fn(LayerNorm(x))."""

    def __init__(self, dim, fn, dtype=jnp.float32, eps=1e-5):
        # nn.LayerNorm default init: weight = 1, bias = 0 (deterministic)
        self.gamma = jnp.ones((dim,), dtype=dtype)
        self.beta = jnp.zeros((dim,), dtype=dtype)
        self.eps = eps
        self.fn = fn

    def __call__(self, x, **kwargs):
        if isinstance(self.fn, Linear):
            # Fused LN + matmul: normalized tensor never hits HBM.
            return prenorm_linear(x, self.gamma, self.beta,
                                  self.fn.w, self.fn.b, eps=self.eps)
        # Generic fallback: Pallas LayerNorm, then arbitrary fn.
        return self.fn(layer_norm(x, self.gamma, self.beta, eps=self.eps),
                       **kwargs)


# --------------------------------- demo --------------------------------------
if __name__ == "__main__":
    B, N, D = 2, 8, 128          # batch, sequence length, embed dim
    Dout = 128

    key = jax.random.PRNGKey(0)
    kx, kw, kb, kw2, kb2 = jax.random.split(key, 5)
    x = jax.random.normal(kx, (B, N, D), dtype=jnp.float32)
    w = jax.random.normal(kw, (D, Dout), dtype=jnp.float32) * (1.0 / D ** 0.5)
    b = jax.random.normal(kb, (Dout,), dtype=jnp.float32) * 0.01

    module = PreNorm(D, Linear(w, b))
    out = module(x)
    jax.block_until_ready(out)
    assert out.shape == (B, N, Dout)

    # Reference: LN in f32; matmul with bf16-rounded operands, f32 accumulate
    # (matches the fused kernel's MXU feed).
    mean = jnp.mean(x, axis=-1, keepdims=True)
    var = jnp.mean((x - mean) ** 2, axis=-1, keepdims=True)
    ref_norm = (x - mean) * jax.lax.rsqrt(var + 1e-5)
    ref = jnp.einsum(
        "bnd,de->bne",
        ref_norm.astype(jnp.bfloat16).astype(jnp.float32),
        w.astype(jnp.bfloat16).astype(jnp.float32),
    ) + b
    assert jnp.allclose(out, ref, atol=2e-2, rtol=2e-2), \
        float(jnp.max(jnp.abs(out - ref)))

    # Exercise the large-weight (Dout-tiled, cached-LN) path explicitly.
    out_tiled = prenorm_linear(x, module.gamma, module.beta,
                               module.fn.w, module.fn.b,
                               resident_w_max_bytes=0)
    jax.block_until_ready(out_tiled)
    assert jnp.allclose(out_tiled, ref, atol=2e-2, rtol=2e-2)

    # Exercise the Dout-padding path (Dout not a multiple of 128).
    Dout2 = 72
    w2 = jax.random.normal(kw2, (D, Dout2), dtype=jnp.float32) * (1.0 / D ** 0.5)
    b2 = jax.random.normal(kb2, (Dout2,), dtype=jnp.float32) * 0.01
    out2 = PreNorm(D, Linear(w2, b2))(x)
    jax.block_until_ready(out2)
    ref2 = jnp.einsum(
        "bnd,de->bne",
        ref_norm.astype(jnp.bfloat16).astype(jnp.float32),
        w2.astype(jnp.bfloat16).astype(jnp.float32),
    ) + b2
    assert out2.shape == (B, N, Dout2)
    assert jnp.allclose(out2, ref2, atol=2e-2, rtol=2e-2)

    # Generic-fn fallback: standalone Pallas LayerNorm, then arbitrary fn.
    gen = PreNorm(D, lambda y: y * 2.0)(x)
    jax.block_until_ready(gen)
    assert jnp.allclose(gen, ref_norm * 2.0, atol=1e-4, rtol=1e-4)

    print("KERNEL_OK")
</pallas_src>

<mosaic_0001>
module attributes {stable_mosaic.version = 11 : i64} {
  func.func @_prenorm_linear_resident_kernel(%arg0: i32, %arg1: memref<8x128xf32, #tpu.memory_space<vmem>>, %arg2: memref<1x128xf32, #tpu.memory_space<vmem>>, %arg3: memref<1x128xf32, #tpu.memory_space<vmem>>, %arg4: memref<128x128xbf16, #tpu.memory_space<vmem>>, %arg5: memref<1x128xf32, #tpu.memory_space<vmem>>, %arg6: memref<8x128xf32, #tpu.memory_space<vmem>>) attributes {dimension_semantics = [#tpu.dimension_semantics<parallel>], iteration_bounds = array<i64: 2>, scalar_prefetch = 0 : i64, scratch_operands = 0 : i64, tpu.core_type = #tpu.core_type<tc>, window_params = [{transform_indices = @transform_0, window_bounds = array<i64: 8, 128>}, {pipeline_mode = #tpu.pipeline_mode<synchronous>, transform_indices = @transform_1, window_bounds = array<i64: 1, 128>}, {pipeline_mode = #tpu.pipeline_mode<synchronous>, transform_indices = @transform_2, window_bounds = array<i64: 1, 128>}, {pipeline_mode = #tpu.pipeline_mode<synchronous>, transform_indices = @transform_3, window_bounds = array<i64: 128, 128>}, {pipeline_mode = #tpu.pipeline_mode<synchronous>, transform_indices = @transform_4, window_bounds = array<i64: 1, 128>}, {transform_indices = @transform_5, window_bounds = array<i64: 8, 128>}]} {
    %c0 = arith.constant 0 : index
    %c0_0 = arith.constant 0 : index
    %0 = vector.load %arg1[%c0, %c0_0] : memref<8x128xf32, #tpu.memory_space<vmem>>, vector<8x128xf32>
    %c0_1 = arith.constant 0 : index
    %c0_2 = arith.constant 0 : index
    %1 = vector.load %arg2[%c0_1, %c0_2] : memref<1x128xf32, #tpu.memory_space<vmem>>, vector<1x128xf32>
    %c0_3 = arith.constant 0 : index
    %c0_4 = arith.constant 0 : index
    %2 = vector.load %arg3[%c0_3, %c0_4] : memref<1x128xf32, #tpu.memory_space<vmem>>, vector<1x128xf32>
    %cst = arith.constant dense<0.000000e+00> : vector<8xf32>
    %3 = vector.multi_reduction <add>, %0, %cst [1] : vector<8x128xf32> to vector<8xf32>
    %4 = vector.shape_cast %3 : vector<8xf32> to vector<8x1xf32>
    %cst_5 = arith.constant 7.812500e-03 : f32
    %5 = vector.broadcast %cst_5 : f32 to vector<8x1xf32>
    %6 = arith.mulf %4, %5 : vector<8x1xf32>
    %7 = vector.broadcast %6 : vector<8x1xf32> to vector<8x128xf32>
    %8 = arith.subf %0, %7 : vector<8x128xf32>
    %9 = arith.mulf %8, %8 : vector<8x128xf32>
    %cst_6 = arith.constant dense<0.000000e+00> : vector<8xf32>
    %10 = vector.multi_reduction <add>, %9, %cst_6 [1] : vector<8x128xf32> to vector<8xf32>
    %11 = vector.shape_cast %10 : vector<8xf32> to vector<8x1xf32>
    %cst_7 = arith.constant 7.812500e-03 : f32
    %12 = vector.broadcast %cst_7 : f32 to vector<8x1xf32>
    %13 = arith.mulf %11, %12 : vector<8x1xf32>
    %cst_8 = arith.constant 9.99999974E-6 : f32
    %14 = vector.broadcast %cst_8 : f32 to vector<8x1xf32>
    %15 = arith.addf %13, %14 : vector<8x1xf32>
    %16 = math.rsqrt %15 : vector<8x1xf32>
    %17 = vector.broadcast %16 : vector<8x1xf32> to vector<8x128xf32>
    %18 = arith.mulf %8, %17 : vector<8x128xf32>
    %19 = vector.broadcast %1 : vector<1x128xf32> to vector<8x128xf32>
    %20 = arith.mulf %18, %19 : vector<8x128xf32>
    %21 = vector.broadcast %2 : vector<1x128xf32> to vector<8x128xf32>
    %22 = arith.addf %20, %21 : vector<8x128xf32>
    %23 = arith.truncf %22 : vector<8x128xf32> to vector<8x128xbf16>
    %c0_9 = arith.constant 0 : index
    %c0_10 = arith.constant 0 : index
    %24 = vector.load %arg4[%c0_9, %c0_10] : memref<128x128xbf16, #tpu.memory_space<vmem>>, vector<128x128xbf16>
    %cst_11 = arith.constant dense<0.000000e+00> : vector<8x128xf32>
    %25 = tpu.matmul %23, %24, %cst_11 {dimension_numbers = #tpu.dot_dimension_numbers<[1], [0], [0], [1], [0, 0, 1, 1], [], []>} : vector<8x128xbf16>, vector<128x128xbf16>, vector<8x128xf32> -> vector<8x128xf32>
    %c0_12 = arith.constant 0 : index
    %c0_13 = arith.constant 0 : index
    %26 = vector.load %arg5[%c0_12, %c0_13] : memref<1x128xf32, #tpu.memory_space<vmem>>, vector<1x128xf32>
    %27 = vector.broadcast %26 : vector<1x128xf32> to vector<8x128xf32>
    %28 = arith.addf %25, %27 : vector<8x128xf32>
    %c0_14 = arith.constant 0 : index
    %c0_15 = arith.constant 0 : index
    %29 = vector.load %arg6[%c0_14, %c0_15] : memref<8x128xf32, #tpu.memory_space<vmem>>, vector<8x128xf32>
    tpu.vector_store %arg6[%c0_14, %c0_15], %28 {strides = array<i32>} : memref<8x128xf32, #tpu.memory_space<vmem>>, vector<8x128xf32>,
    return
  }
  func.func @transform_0(%arg0: i32) -> (i32, i32) {
    %c0_i32 = arith.constant 0 : i32
    %c0_i32_0 = arith.constant 0 : i32
    return %arg0, %c0_i32 : i32, i32
  }
  func.func @transform_1(%arg0: i32) -> (i32, i32) {
    %c0_i32 = arith.constant 0 : i32
    %c0_i32_0 = arith.constant 0 : i32
    %c0_i32_1 = arith.constant 0 : i32
    return %c0_i32, %c0_i32_0 : i32, i32
  }
  func.func @transform_2(%arg0: i32) -> (i32, i32) {
    %c0_i32 = arith.constant 0 : i32
    %c0_i32_0 = arith.constant 0 : i32
    %c0_i32_1 = arith.constant 0 : i32
    return %c0_i32, %c0_i32_0 : i32, i32
  }
  func.func @transform_3(%arg0: i32) -> (i32, i32) {
    %c0_i32 = arith.constant 0 : i32
    %c0_i32_0 = arith.constant 0 : i32
    %c0_i32_1 = arith.constant 0 : i32
    return %c0_i32, %c0_i32_0 : i32, i32
  }
  func.func @transform_4(%arg0: i32) -> (i32, i32) {
    %c0_i32 = arith.constant 0 : i32
    %c0_i32_0 = arith.constant 0 : i32
    %c0_i32_1 = arith.constant 0 : i32
    return %c0_i32, %c0_i32_0 : i32, i32
  }
  func.func @transform_5(%arg0: i32) -> (i32, i32) {
    %c0_i32 = arith.constant 0 : i32
    %c0_i32_0 = arith.constant 0 : i32
    return %arg0, %c0_i32 : i32, i32
  }
}

</mosaic_0001>

<bundles_post_ra>
// kernel: tpu_custom_call.1
= control target key start
LH: loop header
LB: loop body
LE: loop exit
PB: predicated region body
PF: predicated region fallthrough
CT: control target
= control target key end

     0   :  { %10 = vsyncpa [#allocation3], 0  ;;  %s992_s0 = inlined_call_operand.hbm [shape: f32[16,128], index: 0, kind: input, shape index: {}]   ;;  %s993_s1 = inlined_call_operand.vmem [shape: f32[1,128], index: 1, kind: input, shape index: {}]   ;;  %s994_s2 = inlined_call_operand.vmem [shape: f32[1,128], index: 2, kind: input, shape index: {}]   ;;  %s995_s3 = inlined_call_operand.hbm [shape: bf16[128,128], index: 3, kind: input, shape index: {}]   ;;  %s996_s4 = inlined_call_operand.vmem [shape: f32[1,128], index: 4, kind: input, shape index: {}]   ;;  %s997_s5 = inlined_call_operand.hbm [shape: f32[16,128], index: 5, kind: output, shape index: {}]  }
   0x1   :  { %12 = vsyncpa [#allocation3 + $0x1], 0 }
   0x2   :  { %13 = vsyncpa [#allocation6], 0 }
   0x3   :  { %14 = vsyncpa [#allocation4], 0 }
   0x4   :  { %16 = vsyncpa [#allocation4 + $0x1], 0  ;;  %s783_s18 = smov 0   ;;  %s785_s19 = smov 0  }
   0x5   :  { %s787_s20 = smov 0   ;;  %s789_s21 = smov 0  }
   0x6 LB: > { %s804_s22 = sadd.s32 4294967295, %s744_s21   ;;  %s491_s23 = sadd.s32 4294967294, %s744_s21   ;;  %s744_s21 = sphi %s789_s21, %s1017_s21   ;;  %s740_s20 = sphi %s787_s20, %s1016_s20   ;;  %s736_s19 = sphi %s785_s19, %s1015_s19   ;;  %s732_s18 = sphi %s783_s18, %s1014_s18  }
   0x7   : > { %p42_p0 = scmp.ne.s32.totalorder %s736_s19, %s732_s18  ;;  %p998_p1 = scmp.eq.s32.totalorder %s804_s22, 0 }
   0x8   : > { %p156_p3 = scmp.eq.s32.totalorder %s491_s23, 1  ;;  %p492_p5 = scmp.ge.s32.totalorder %s744_s21, 1 }
   0x9   : > { %p813_p4 = por %p998_p1, %p42_p0  ;;  %p163_p7 = scmp.lt.s32.totalorder %s744_s21, 3 }
   0xa   : > { %p818_p6 = por %p156_p3, %p42_p0  ;;  %s746_s27 = smov [#allocation5]  }
   0xb   : > { %s1001_s24 = scalar_select %p813_p4, 1, 0 }
   0xc   : > { %s1002_s25 = scalar_select %p818_p6, 1, 0 }
   0xd   : > { %p823_p8 = pnand %p492_p5, %p163_p7  ;;  %s181_s28 = sshll.u32 %s746_s27, 4  ;;  %s827_s28 = int_to_ptr.vmem [resolvable:$true] %s181_s28 }
   0xe   : > { %s839_s30 = sadd.s32 1, %s744_s21   ;;  %s29_s6 = sadd.s32 1, %s740_s20 }
   0xf   : > { %s1003_s26 = scalar_select %p823_p8, 1, 0 }
  0x10   : > { %p553_p9 = pneg %p823_p8  ;;  %s26_s7 = ssub.s32 %s744_s21, %s839_s30 }
  0x11   : > { %s616_s10 = scalar_lea.hbm %s995_s3, 1024 }
  0x12   : > { %p834_p11 = pnand %p553_p9, %p998_p1  ;;  %p617_p12 = scmp.ne.s32.totalorder %s995_s3, %s616_s10 }
  0x13   : > { %p623_p5 = scmp.lt.u32.totalorder %s616_s10, %s995_s3 }
  0x14   : > { %p618_p13 = pneg %p834_p11 }
  0x16   : > { %p619_p0 = pnand %p618_p13, %p617_p12 }
  0x18   : > { %p620_p3 = pneg %p619_p0 }
  0x1a   : > { %p625_p7 = pnand %p623_p5, %p620_p3 }
  0x1c   : > { %628 = shalt.err (!%p625_p7)
}
  0x1d   : > { %s629_s15 = scalar_lea.vmem %s827_s28, 1024  ;;  %p637_p2 = scmp.lt.s32.totalorder %s827_s28, %s827_s28 }
  0x1e   : > { %p630_p9 = scmp.ne.s32.totalorder %s827_s28, %s629_s15  ;;  %p638_p6 = scmp.lt.s32.totalorder %s629_s15, %s629_s15 }
  0x20   : > { %p632_p10 = pnand %p630_p9, %p618_p13  ;;  %p639_p4 = por %p638_p6, %p637_p2 }
  0x22   : > { %p633_p1 = pneg %p632_p10 }
  0x24   : > { %p640_p8 = pnand %p639_p4, %p633_p1 }
  0x26   : > { %643 = shalt.err (!%p640_p8)
}
  0x27   : > { %s747_s16 = smov 64   ;;  %s748_s17 = smov 4  }
  0x28   : > { %556 = dma.hbm_to_vmem [thread:$0]  (!%p834_p11), %s995_s3, 1024, %s827_s28, [#allocation6], %s747_s16, %s747_s16, %s748_s17  }
  0x29   : > { %p27_p2 = scmp.eq.s32.totalorder %s26_s7, 0  ;;  %p36_p1 = scmp.ne.s32.totalorder %s740_s20, %s736_s19 }
  0x2a   : > { %p37_p4 = scmp.eq.s32.totalorder %s744_s21, 0  ;;  %p566_p6 = scmp.lt.s32.totalorder %s744_s21, 2 }
  0x2b   : > { %s870_s8 = scalar_select %p27_p2, %s740_s20, %s29_s6  }
  0x2c   : > { %p38_p8 = por %p37_p4, %p36_p1  ;;  %p1005_p10 = scmp.eq.s32.totalorder %s804_s22, 1 }
  0x2d   : > { %s198_s10 = sand.u32 1, %s740_s20   ;;  %s496_s11 = sshll.u32 %s744_s21, 7 }
  0x2e   : > { %p874_p12 = por %p1005_p10, %p36_p1  ;;  %s495_s12 = sshll.u32 %s198_s10, 3 }
  0x2f   : > { %s883_s14 = scalar_lea.hbm %s992_s0, %s496_s11  ;;  %s202_s28 = scalar_lea.vmem [#allocation2], %s495_s12 }
  0x30   : > { %s209_s6 = sshll.u32 %s202_s28, 4  ;;  %p885_p11 = pnand %p566_p6, %p38_p8  ;;  %s889_s6 = int_to_ptr.vmem [resolvable:$true] %s209_s6 }
  0x31   : > { %s199_s15 = scalar_lea.sflag [#allocation3], %s198_s10  ;;  %s644_s16 = scalar_lea.hbm %s883_s14, 128 }
  0x32   : > { %p645_p13 = scmp.ne.s32.totalorder %s883_s14, %s644_s16  ;;  %p646_p0 = pneg %p885_p11 }
  0x33   : > { %s649_s27 = scalar_lea.hbm %s992_s0, 256  ;;  %p650_p7 = scmp.lt.u32.totalorder %s883_s14, %s992_s0 }
  0x34   : > { %p647_p3 = pnand %p646_p0, %p645_p13  ;;  %p651_p9 = scmp.lt.u32.totalorder %s649_s27, %s644_s16 }
  0x35   : > { %p653_p1 = scmp.lt.u32.totalorder %s644_s16, %s883_s14 }
  0x36   : > { %p648_p5 = pneg %p647_p3  ;;  %p652_p2 = por %p651_p9, %p650_p7 }
  0x38   : > { %p654_p4 = por %p653_p1, %p652_p2 }
  0x3a   : > { %p655_p6 = pnand %p654_p4, %p648_p5 }
  0x3c   : > { %658 = shalt.err (!%p655_p6)
}
  0x3d   : > { %s659_s10 = scalar_lea.vmem %s889_s6, 128  ;;  %s749_s29 = smov [#allocation2]  }
  0x3e   : > { %p660_p8 = scmp.ne.s32.totalorder %s889_s6, %s659_s10  ;;  %s664_s13 = sshll.u32 %s749_s29, 4  ;;  %s665_s13 = int_to_ptr.vmem [resolvable:$false] %s664_s13 }
  0x3f   : > { %s666_s28 = scalar_lea.vmem %s665_s13, 256  ;;  %p667_p3 = scmp.lt.s32.totalorder %s889_s6, %s665_s13 }
  0x40   : > { %p662_p10 = pnand %p660_p8, %p646_p0  ;;  %p668_p7 = scmp.lt.s32.totalorder %s666_s28, %s659_s10 }
  0x42   : > { %p663_p13 = pneg %p662_p10  ;;  %p669_p9 = por %p668_p7, %p667_p3 }
  0x44   : > { %p670_p2 = pnand %p669_p9, %p663_p13 }
  0x46   : > { %673 = shalt.err (!%p670_p2)
}
  0x47   : > { %560 = dma.hbm_to_vmem [thread:$0]  (!%p885_p11), %s883_s14, 128, %s889_s6, %s199_s15  }
  0x48   : > { %p1008_p5 = scmp.ne.s32.totalorder %s1003_s26, 0 }
  0x49   : > { %s919_s16 = sand.u32 (!%p1008_p5), 1, %s736_s19   ;;  %p1009_p0 = scmp.ne.s32.totalorder (!%p1008_p5), %s1001_s24, 0 }
  0x4a   : > { %218 = sbr.rel (%p1008_p5) target bundleno = 627 (0x273), region = 40  ;;  %s498_s17 = sshll.u32 (!%p1008_p5), %s919_s16, 3 }
  0x4b   : > { %s221_s23 = scalar_lea.sflag (!%p1008_p5), [#allocation3], %s919_s16  ;;  %s224_s27 = scalar_lea.vmem (!%p1008_p5), [#allocation2], %s498_s17 }
  0x51   : > { %719 = dma.done.wait (%p1009_p0), %s221_s23, 128  }
  0x52   : > { %721 = vsyncadd (%p1009_p0), %s221_s23, 4294967168  ;;  %p1010_p11 = scmp.eq.s32.totalorder %s804_s22, 0 }
  0x54   : > { %723 = dma.done.wait (%p1010_p11), [#allocation6], 1024   ;;  %p1011_p1 = pmov %p1010_p11 }
  0x55   : > { %v256_v0 = vld [vmem:[%s224_s27] sm:$0xff]  ;;  %v606_v1 = vld [vmem:[#allocation5] sm:$0xff]   ;;  %v750_v2 = vmov 0.0   ;;  %v607_v3 = vld [vmem:[#allocation5 + $0x8] sm:$0xff]   ;;  %vm751_vm0 = vmmov 0   ;;  %s513_s11 = sshll.u32 %s804_s22, 7 }
  0x56   : > { %725 = vsyncadd (%p1011_p1), [#allocation6], 4294966272  ;;  %259 = vadd.xlane.f32.xlu0 %v256_v0  ;;  %525 = vmatprep.subr.bf16.mxu0 %v750_v2  ;;  %v608_v8 = vld [vmem:[#allocation5 + $0x10] sm:$0xff]   ;;  %v609_v9 = vld [vmem:[#allocation5 + $0x18] sm:$0xff]   ;;  %s254_s12 = scalar_lea.vmem [#allocation7], %s498_s17  ;;  %s948_s28 = scalar_lea.hbm %s997_s5, %s513_s11 }
  0x57   : > { %526 = vmatpush3.bf16.msra.mxu0 %v606_v1  ;;  %v610_v10 = vld [vmem:[#allocation5 + $0x20] sm:$0xff]   ;;  %541 = vmatprep.mubr.msk.bf16.mxu0 %vm751_vm0, %v750_v2  ;;  %v611_v11 = vld [vmem:[#allocation5 + $0x28] sm:$0xff]   ;;  %v612_v12 = vld [vmem:[#allocation5 + $0x30] sm:$0xff]   ;;  %s411_s10 = sshll.u32 %s254_s12, 4  ;;  %s398_s22 = scalar_lea.sflag [#allocation4], %s919_s16  ;;  %s950_s10 = int_to_ptr.vmem [resolvable:$true] %s411_s10 }
  0x58   : > { %527 = vmatprep.subr.bf16.mxu0 %v750_v2  ;;  %v613_v13 = vld [vmem:[#allocation5 + $0x38] sm:$0xff]   ;;  %v501_v18 = vld [vmem:[%s993_s1] ss:$0 sm:$0xff]  ;;  %s674_s23 = scalar_lea.vmem %s950_s10, 128  ;;  %s752_s17 = smov [#allocation7]  }
  0x59   : > { %v502_v20 = vld [vmem:[%s994_s2] ss:$0 sm:$0xff]  ;;  %p675_p4 = scmp.ne.s32.totalorder %s950_s10, %s674_s23  ;;  %s678_s27 = sshll.u32 %s752_s17, 4  ;;  %s679_s27 = int_to_ptr.vmem [resolvable:$false] %s678_s27 }
  0x5a   : > { %v503_v24 = vld [vmem:[%s996_s4] ss:$0 sm:$0xff]  ;;  %s680_s24 = scalar_lea.vmem %s679_s27, 256  ;;  %p681_p10 = scmp.lt.s32.totalorder %s950_s10, %s679_s27 }
  0x5b   : > { %528 = vmatpush3.bf16.msra.mxu0 %v607_v3  ;;  %p676_p6 = pnand %p675_p4, %p874_p12  ;;  %p682_p13 = scmp.lt.s32.totalorder %s680_s24, %s674_s23 }
  0x5c   : > { %529 = vmatprep.subr.bf16.mxu0 %v750_v2 }
  0x5d   : > { %p677_p8 = pneg %p676_p6  ;;  %p683_p3 = por %p682_p13, %p681_p10 }
  0x5f   : > { %530 = vmatpush3.bf16.msra.mxu0 %v608_v8  ;;  %p684_p7 = pnand %p683_p3, %p677_p8 }
  0x60   : > { %531 = vmatprep.subr.bf16.mxu0 %v750_v2 }
  0x63   : > { %532 = vmatpush3.bf16.msra.mxu0 %v609_v9 }
  0x64   : > { %533 = vmatprep.subr.bf16.mxu0 %v750_v2 }
  0x67   : > { %534 = vmatpush3.bf16.msra.mxu0 %v610_v10 }
  0x68   : > { %535 = vmatprep.subr.bf16.mxu0 %v750_v2 }
  0x6b   : > { %536 = vmatpush3.bf16.msra.mxu0 %v611_v11 }
  0x6c   : > { %537 = vmatprep.subr.bf16.mxu0 %v750_v2 }
  0x6f   : > { %538 = vmatpush3.bf16.msra.mxu0 %v612_v12 }
  0x70   : > { %539 = vmatprep.subr.bf16.mxu0 %v750_v2 }
  0x73   : > { %540 = vmatpush3.bf16.msra.mxu0 %v613_v13 }
  0xe3   : > { %v260_v4 = vpop.xlane.xlu0 %259 }
  0xe4   : > { %v261_v5 = vmul.f32 0.0078125, %v260_v4 }
  0xe6   : > { %v262_v6 = vsub.f32 %v256_v0, %v261_v5 }
  0xe8   : > { %v263_v7 = vmul.f32 %v262_v6, %v262_v6 }
  0xea   : > { %264 = vadd.xlane.f32.xlu0 %v263_v7 }
 0x177   : > { %v265_v14 = vpop.xlane.xlu0 %264 }
 0x178   : > { %v266_v15 = vmul.f32 0.0078125, %v265_v14 }
 0x17a   : > { %v267_v16 = vadd.f32 1e-05, %v266_v15 }
 0x17c   : > { %614 = vrsqrt.f32 %v267_v16 }
 0x186   : > { %v615_v17 = vpop.eup %614 }
 0x187   : > { %v269_v19 = vmul.f32 %v615_v17, %v262_v6 }
 0x189   : > { %v276_v21 = vmul.f32 %v501_v18, %v269_v19 }
 0x18b   : > { %v283_v22 = vadd.f32 %v502_v20, %v276_v21 }
 0x18d   : > { %v284_v23 = vpack.c.bf16 %v283_v22, %v283_v22 }
 0x18f   : > { %542 = vmatmul.mubr.bf16.vlgmr.msra.gmra.mrb[0].mxu0 %v284_v23 }
 0x262   : > { %v390_v25 = vpop.f32.mrb[0].mxu0 }
 0x263   : > { %v391_v26 = vadd.f32 %v503_v24, %v390_v25  ;;  %v543_v27 = vpop.f32.mrb[1].mxu0 }
 0x264   : > { %v393_v28 = vpop.f32.mrb[2].mxu0 }
 0x265   : > { %396 = vst [vmem:[%s254_s12] sm:$0xff] %v391_v26  ;;  %v544_v29 = vpop.f32.mrb[3].mxu0 }
 0x266   : > { %687 = shalt.err (!%p684_p7)
}
 0x267   : > { %s688_s16 = scalar_lea.hbm %s948_s28, 128  ;;  %s692_s6 = scalar_lea.hbm %s997_s5, 256 }
 0x268   : > { %p689_p9 = scmp.ne.s32.totalorder %s948_s28, %s688_s16  ;;  %p693_p0 = scmp.lt.u32.totalorder %s948_s28, %s997_s5 }
 0x269   : > { %p694_p11 = scmp.lt.u32.totalorder %s692_s6, %s688_s16  ;;  %p696_p4 = scmp.lt.u32.totalorder %s688_s16, %s948_s28 }
 0x26a   : > { %p690_p2 = pnand %p689_p9, %p874_p12 }
 0x26b   : > { %p695_p1 = por %p694_p11, %p693_p0 }
 0x26c   : > { %p691_p5 = pneg %p690_p2 }
 0x26d   : > { %p697_p6 = por %p696_p4, %p695_p1 }
 0x26f   : > { %p698_p8 = pnand %p697_p6, %p691_p5 }
 0x271   : > { %701 = shalt.err (!%p698_p8)
}
 0x272   : > { %551 = dma.vmem_to_hbm [thread:$0]  (%p874_p12), %s950_s10, 128, %s948_s28, %s398_s22  }
 0x273 PF: > { %s423_s11 = sand.u32 1, %s732_s18   ;;  %p1012_p10 = scmp.ne.s32.totalorder %s1002_s25, 0 }
 0x274   : > { %p1013_p13 = scmp.ge.s32.totalorder %s744_s21, 2  ;;  %s424_s12 = scalar_lea.sflag [#allocation4], %s423_s11 }
 0x276   : > { %p562_p3 = pnand %p1013_p13, %p1012_p10 }
 0x278   : > { %727 = dma.done.wait (!%p562_p3), %s424_s12, 128  }
 0x279   : > { %729 = vsyncadd (!%p562_p3), %s424_s12, 4294967168  ;;  %p19_p7 = scmp.ge.s32.totalorder %s839_s30, 4   ;;  %s1014_s18 = smov %s736_s19 }
 0x27a   : > { %s1015_s19 = smov %s740_s20  ;;  %s1016_s20 = smov %s870_s8 }
 0x27b   : > { %s1017_s21 = smov %s839_s30  ;;  %21 = sbr.rel (!%p19_p7) target bundleno = 6 (0x6), region = 89 }
 0x282   :  { %429 = vsyncpa [#allocation3], 1 }
 0x283   :  { %431 = vsyncpa [#allocation3 + $0x1], 1 }
 0x284   :  { %432 = vsyncpa [#allocation6], 1 }
 0x285   :  { %433 = vsyncpa [#allocation4], 1 }
 0x286   :  { %435 = vsyncpa [#allocation4 + $0x1], 1 }

</bundles_post_ra>
